<compile_context>
chip_gen: v6e
topology: v6e:2x2x1
jax: 0.10.0
libtpu: 0.0.40
codegen_flags: <defaults>
</compile_context>

<pallas_src>
from functools import partial

import jax
import jax.numpy as jnp
from jax.experimental import pallas as pl
from jax.experimental.pallas import tpu as pltpu

INPUT_SIZE = 10
HIDDEN_SIZE = 50
OUTPUT_SIZE = 1

# ~0.75 KB of VMEM per batch column (double-buffered x/out + two (56, tb) f32 intermediates);
# 32768 columns ~= 25 MiB, comfortable even on v7x (64 MiB physical VMEM).
MAX_TB = 32768


def _round_up(n, m):
    return ((n + m - 1) // m) * m


def mlp_kernel(x_ref, w1_ref, w2_ref, w3_ref, b_ref, out_ref):
    # x_ref:   (INPUT_SIZE, TB)   activations, batch on the 128-wide lane axis
    # w*_ref:  PyTorch (out, in) layout, so each layer is W @ x + b
    # b_ref:   (HIDDEN_SIZE, 3)   col 0 = b1, col 1 = b2, row 0 of col 2 = b3
    x = x_ref[...]                                   # (10, TB) f32

    b1 = b_ref[:, 0:1]                               # (50, 1) broadcasts over lanes
    b2 = b_ref[:, 1:2]                               # (50, 1)
    b3 = b_ref[0:OUTPUT_SIZE, 2:3]                   # (1, 1)

    hi = jax.lax.Precision.HIGHEST

    h1 = jnp.dot(w1_ref[...], x, preferred_element_type=jnp.float32, precision=hi) + b1
    h1 = jnp.maximum(h1, 0.0)                        # (50, TB) ReLU

    h2 = jnp.dot(w2_ref[...], h1, preferred_element_type=jnp.float32, precision=hi) + b2
    h2 = jnp.maximum(h2, 0.0)                        # (50, TB) ReLU

    h3 = jnp.dot(w3_ref[...], h2, preferred_element_type=jnp.float32, precision=hi) + b3

    out_ref[...] = h3.astype(out_ref.dtype)          # (1, TB) lane-dense store


@partial(jax.jit, static_argnames=("block_batch",))
def simple_mlp_forward(x, params, block_batch=8192):
    """x: (B, INPUT_SIZE) f32 -> (B, OUTPUT_SIZE) f32."""
    w1, w2, w3, b_all = params
    B = x.shape[0]

    # Batch tile: multiple of 128 lanes, capped by block_batch and the VMEM ceiling.
    tb = min(block_batch, MAX_TB, _round_up(B, 128))
    # Give v7x's two TensorCores something to split: prefer >= 2 grid steps when B allows.
    if B > 128 and pl.cdiv(B, tb) < 2:
        tb = min(tb, _round_up(pl.cdiv(B, 2), 128))
    grid = (pl.cdiv(B, tb),)

    # Feature-major layout; stays inside this jit so XLA fuses it with producers.
    x_t = x.T                                        # (INPUT_SIZE, B)

    const = lambda a: pl.BlockSpec(a.shape, lambda i: (0, 0))   # VMEM-resident weights

    # Scoped-VMEM budget: ~0.75 KB per batch column + weights/headroom, under v7x's 64 MiB.
    vmem_limit = min(max(768 * tb + (2 << 20), 8 << 20), 56 << 20)

    cost = pl.CostEstimate(
        flops=2 * B * (INPUT_SIZE * HIDDEN_SIZE
                       + HIDDEN_SIZE * HIDDEN_SIZE
                       + HIDDEN_SIZE * OUTPUT_SIZE),
        transcendentals=0,
        bytes_accessed=4 * (B * (INPUT_SIZE + OUTPUT_SIZE)
                            + HIDDEN_SIZE * INPUT_SIZE
                            + HIDDEN_SIZE * HIDDEN_SIZE
                            + OUTPUT_SIZE * HIDDEN_SIZE
                            + HIDDEN_SIZE * 3),
    )

    out_t = pl.pallas_call(
        mlp_kernel,
        out_shape=jax.ShapeDtypeStruct((OUTPUT_SIZE, B), jnp.float32),
        grid=grid,
        in_specs=[
            pl.BlockSpec((INPUT_SIZE, tb), lambda i: (0, i)),   # batch-tiled activations
            const(w1),
            const(w2),
            const(w3),
            const(b_all),
        ],
        out_specs=pl.BlockSpec((OUTPUT_SIZE, tb), lambda i: (0, i)),
        compiler_params=pltpu.CompilerParams(
            dimension_semantics=("parallel",),       # shards batch steps across v7x's 2 TCs
            vmem_limit_bytes=vmem_limit,
        ),
        cost_estimate=cost,
    )(x_t, w1, w2, w3, b_all)

    return out_t.T                                   # (B, OUTPUT_SIZE)


def init_params(key):
    """Deterministic init mimicking PyTorch nn.Linear default:
    U(-1/sqrt(fan_in), 1/sqrt(fan_in)) for weights and biases.
    Weights kept in PyTorch (out, in) layout; biases packed into one (HIDDEN, 3) slab."""
    def linear(key, fan_in, fan_out):
        kw, kb = jax.random.split(key)
        bound = 1.0 / jnp.sqrt(jnp.float32(fan_in))
        w = jax.random.uniform(kw, (fan_out, fan_in), jnp.float32, -bound, bound)
        b = jax.random.uniform(kb, (fan_out,), jnp.float32, -bound, bound)
        return w, b

    k1, k2, k3 = jax.random.split(key, 3)
    w1, b1 = linear(k1, INPUT_SIZE, HIDDEN_SIZE)
    w2, b2 = linear(k2, HIDDEN_SIZE, HIDDEN_SIZE)
    w3, b3 = linear(k3, HIDDEN_SIZE, OUTPUT_SIZE)

    b_all = jnp.zeros((HIDDEN_SIZE, 3), jnp.float32)
    b_all = b_all.at[:, 0].set(b1)
    b_all = b_all.at[:, 1].set(b2)
    b_all = b_all.at[:OUTPUT_SIZE, 2].set(b3)
    return (w1, w2, w3, b_all)


def reference_forward(x, params):
    w1, w2, w3, b_all = params
    b1 = b_all[:, 0]
    b2 = b_all[:, 1]
    b3 = b_all[:OUTPUT_SIZE, 2]
    hi = jax.lax.Precision.HIGHEST
    h = jnp.maximum(jnp.dot(x, w1.T, precision=hi) + b1, 0.0)
    h = jnp.maximum(jnp.dot(h, w2.T, precision=hi) + b2, 0.0)
    return jnp.dot(h, w3.T, precision=hi) + b3


if __name__ == "__main__":
    key = jax.random.PRNGKey(0)
    kp, kx1, kx2 = jax.random.split(key, 3)

    params = init_params(kp)

    # Small-shape check (single grid step, partial batch block masked by Pallas).
    batch = 8
    x = jax.random.normal(kx1, (batch, INPUT_SIZE), jnp.float32)
    out = jax.block_until_ready(simple_mlp_forward(x, params))
    ref = reference_forward(x, params)
    assert out.shape == (batch, OUTPUT_SIZE), out.shape
    assert jnp.allclose(out, ref, atol=1e-5, rtol=1e-5), "mismatch vs reference (batch=8)"

    # Multi-step grid check: B=1000 -> tb=512, grid=(2,) (exercises pipelining, megacore
    # split, and the masked partial last block with no wrapper padding).
    batch2 = 1000
    x2 = jax.random.normal(kx2, (batch2, INPUT_SIZE), jnp.float32)
    out2 = jax.block_until_ready(simple_mlp_forward(x2, params))
    ref2 = reference_forward(x2, params)
    assert out2.shape == (batch2, OUTPUT_SIZE), out2.shape
    assert jnp.allclose(out2, ref2, atol=1e-5, rtol=1e-5), "mismatch vs reference (batch=1000)"

    print("KERNEL_OK")
</pallas_src>

<mosaic_0001>
module attributes {stable_mosaic.version = 11 : i64} {
  func.func @mlp_kernel(%arg0: i32, %arg1: memref<10x128xf32, #tpu.memory_space<vmem>>, %arg2: memref<50x10xf32, #tpu.memory_space<vmem>>, %arg3: memref<50x50xf32, #tpu.memory_space<vmem>>, %arg4: memref<1x50xf32, #tpu.memory_space<vmem>>, %arg5: memref<50x3xf32, #tpu.memory_space<vmem>>, %arg6: memref<1x128xf32, #tpu.memory_space<vmem>>) attributes {dimension_semantics = [#tpu.dimension_semantics<parallel>], iteration_bounds = array<i64: 1>, scalar_prefetch = 0 : i64, scratch_operands = 0 : i64, tpu.core_type = #tpu.core_type<tc>, window_params = [{transform_indices = @transform_0, window_bounds = array<i64: 10, 128>}, {pipeline_mode = #tpu.pipeline_mode<synchronous>, transform_indices = @transform_1, window_bounds = array<i64: 50, 10>}, {pipeline_mode = #tpu.pipeline_mode<synchronous>, transform_indices = @transform_2, window_bounds = array<i64: 50, 50>}, {pipeline_mode = #tpu.pipeline_mode<synchronous>, transform_indices = @transform_3, window_bounds = array<i64: 1, 50>}, {pipeline_mode = #tpu.pipeline_mode<synchronous>, transform_indices = @transform_4, window_bounds = array<i64: 50, 3>}, {transform_indices = @transform_5, window_bounds = array<i64: 1, 128>}]} {
    %c0 = arith.constant 0 : index
    %c0_0 = arith.constant 0 : index
    %0 = vector.load %arg1[%c0, %c0_0] : memref<10x128xf32, #tpu.memory_space<vmem>>, vector<10x128xf32>
    %c0_1 = arith.constant 0 : index
    %c0_2 = arith.constant 0 : index
    %1 = vector.load %arg5[%c0_1, %c0_2] : memref<50x3xf32, #tpu.memory_space<vmem>>, vector<50x1xf32>
    %c0_3 = arith.constant 0 : index
    %c1 = arith.constant 1 : index
    %2 = vector.load %arg5[%c0_3, %c1] : memref<50x3xf32, #tpu.memory_space<vmem>>, vector<50x1xf32>
    %c0_4 = arith.constant 0 : index
    %c2 = arith.constant 2 : index
    %3 = vector.load %arg5[%c0_4, %c2] : memref<50x3xf32, #tpu.memory_space<vmem>>, vector<1x1xf32>
    %c0_5 = arith.constant 0 : index
    %c0_6 = arith.constant 0 : index
    %4 = vector.load %arg2[%c0_5, %c0_6] : memref<50x10xf32, #tpu.memory_space<vmem>>, vector<50x10xf32>
    %cst = arith.constant dense<0.000000e+00> : vector<50x128xf32>
    %5 = tpu.matmul %4, %0, %cst {dimension_numbers = #tpu.dot_dimension_numbers<[1], [0], [0], [1], [0, 0, 1, 1], [], []>, precision = #tpu.contract_precision<fp32>} : vector<50x10xf32>, vector<10x128xf32>, vector<50x128xf32> -> vector<50x128xf32>
    %6 = vector.broadcast %1 : vector<50x1xf32> to vector<50x128xf32>
    %7 = arith.addf %5, %6 : vector<50x128xf32>
    %cst_7 = arith.constant 0.000000e+00 : f32
    %8 = vector.broadcast %cst_7 : f32 to vector<50x128xf32>
    %9 = arith.maximumf %7, %8 : vector<50x128xf32>
    %c0_8 = arith.constant 0 : index
    %c0_9 = arith.constant 0 : index
    %10 = vector.load %arg3[%c0_8, %c0_9] : memref<50x50xf32, #tpu.memory_space<vmem>>, vector<50x50xf32>
    %cst_10 = arith.constant dense<0.000000e+00> : vector<50x128xf32>
    %11 = tpu.matmul %10, %9, %cst_10 {dimension_numbers = #tpu.dot_dimension_numbers<[1], [0], [0], [1], [0, 0, 1, 1], [], []>, precision = #tpu.contract_precision<fp32>} : vector<50x50xf32>, vector<50x128xf32>, vector<50x128xf32> -> vector<50x128xf32>
    %12 = vector.broadcast %2 : vector<50x1xf32> to vector<50x128xf32>
    %13 = arith.addf %11, %12 : vector<50x128xf32>
    %cst_11 = arith.constant 0.000000e+00 : f32
    %14 = vector.broadcast %cst_11 : f32 to vector<50x128xf32>
    %15 = arith.maximumf %13, %14 : vector<50x128xf32>
    %c0_12 = arith.constant 0 : index
    %c0_13 = arith.constant 0 : index
    %16 = vector.load %arg4[%c0_12, %c0_13] : memref<1x50xf32, #tpu.memory_space<vmem>>, vector<1x50xf32>
    %cst_14 = arith.constant dense<0.000000e+00> : vector<1x128xf32>
    %17 = tpu.matmul %16, %15, %cst_14 {dimension_numbers = #tpu.dot_dimension_numbers<[1], [0], [0], [1], [0, 0, 1, 1], [], []>, precision = #tpu.contract_precision<fp32>} : vector<1x50xf32>, vector<50x128xf32>, vector<1x128xf32> -> vector<1x128xf32>
    %18 = vector.broadcast %3 : vector<1x1xf32> to vector<1x128xf32>
    %19 = arith.addf %17, %18 : vector<1x128xf32>
    %c0_15 = arith.constant 0 : index
    %c0_16 = arith.constant 0 : index
    %20 = vector.load %arg6[%c0_15, %c0_16] : memref<1x128xf32, #tpu.memory_space<vmem>>, vector<1x128xf32>
    tpu.vector_store %arg6[%c0_15, %c0_16], %19 {strides = array<i32>} : memref<1x128xf32, #tpu.memory_space<vmem>>, vector<1x128xf32>,
    return
  }
  func.func @transform_0(%arg0: i32) -> (i32, i32) {
    %c0_i32 = arith.constant 0 : i32
    %c0_i32_0 = arith.constant 0 : i32
    return %c0_i32, %arg0 : i32, i32
  }
  func.func @transform_1(%arg0: i32) -> (i32, i32) {
    %c0_i32 = arith.constant 0 : i32
    %c0_i32_0 = arith.constant 0 : i32
    %c0_i32_1 = arith.constant 0 : i32
    return %c0_i32, %c0_i32_0 : i32, i32
  }
  func.func @transform_2(%arg0: i32) -> (i32, i32) {
    %c0_i32 = arith.constant 0 : i32
    %c0_i32_0 = arith.constant 0 : i32
    %c0_i32_1 = arith.constant 0 : i32
    return %c0_i32, %c0_i32_0 : i32, i32
  }
  func.func @transform_3(%arg0: i32) -> (i32, i32) {
    %c0_i32 = arith.constant 0 : i32
    %c0_i32_0 = arith.constant 0 : i32
    %c0_i32_1 = arith.constant 0 : i32
    return %c0_i32, %c0_i32_0 : i32, i32
  }
  func.func @transform_4(%arg0: i32) -> (i32, i32) {
    %c0_i32 = arith.constant 0 : i32
    %c0_i32_0 = arith.constant 0 : i32
    %c0_i32_1 = arith.constant 0 : i32
    return %c0_i32, %c0_i32_0 : i32, i32
  }
  func.func @transform_5(%arg0: i32) -> (i32, i32) {
    %c0_i32 = arith.constant 0 : i32
    %c0_i32_0 = arith.constant 0 : i32
    return %c0_i32, %arg0 : i32, i32
  }
}

</mosaic_0001>

<bundles_post_ra>
// kernel: simple_mlp_forward.1
= control target key start
LH: loop header
LB: loop body
LE: loop exit
PB: predicated region body
PF: predicated region fallthrough
CT: control target
= control target key end

     0   :  { %vm95_vm0 = vcmask 1041408   ;;  %v2905_v2 = vmov 0.0   ;;  %vm2906_vm1 = vmmov 0   ;;  %vm73_vm2 = vcmask 80896   ;;  %s3884_s0 = inlined_call_operand.vmem [shape: f32[10,8], index: 0, kind: input, shape index: {}]   ;;  %s3885_s1 = inlined_call_operand.vmem [shape: f32[50,10], index: 1, kind: input, shape index: {}]   ;;  %s3886_s2 = inlined_call_operand.vmem [shape: f32[50,50], index: 2, kind: input, shape index: {}]   ;;  %s3887_s3 = inlined_call_operand.vmem [shape: f32[1,50], index: 3, kind: input, shape index: {}]   ;;  %s3888_s4 = inlined_call_operand.vmem [shape: f32[50,3], index: 4, kind: input, shape index: {}]   ;;  %s3889_s5 = inlined_call_operand.hbm [shape: f32[1,8], index: 5, kind: output, shape index: {}]  }
   0x1   :  { %v22_v0 = vld [vmem:[%s3884_s0 + $0x8] sm:$0x3]  ;;  %v21_v1 = vld [vmem:[%s3884_s0] sm:$0xff]  ;;  %2409 = vmatprep.subr.mxu0 %v2905_v2  ;;  %2413 = vmatprep.mubr.msk.f32.mxu0 %vm2906_vm1, %v2905_v2  ;;  %v33_v7 = vld [vmem:[%s3885_s1 + $0x10] sm:$0xff] }
   0x2   :  { %v97_v3 = vsel %vm95_vm0, %v22_v0, 0  ;;  %v2949_v4 = vand.u32 4294901760, %v21_v1  ;;  %v31_v5 = vld [vmem:[%s3885_s1] sm:$0xff]  ;;  %v32_v6 = vld [vmem:[%s3885_s1 + $0x8] sm:$0xff]  ;;  %2434 = vmatprep.subr.mxu1 %v2905_v2  ;;  %2438 = vmatprep.mubr.msk.f32.mxu1 %vm2906_vm1, %v2905_v2  ;;  %v81_v11 = vsel %vm73_vm2, %v33_v7, 0  ;;  %v34_v12 = vld [vmem:[%s3885_s1 + $0x18] sm:$0xff] }
   0x3   :  { %v2962_v8 = vand.u32 4294901760, %v97_v3  ;;  %v75_v9 = vsel %vm73_vm2, %v31_v5, 0  ;;  %v78_v10 = vsel %vm73_vm2, %v32_v6, 0  ;;  %v35_v13 = vld [vmem:[%s3885_s1 + $0x20] sm:$0xff]  ;;  %v2983_v17 = vand.u32 4294901760, %v81_v11  ;;  %v36_v25 = vld [vmem:[%s3885_s1 + $0x28] sm:$0xff] }
   0x4   :  { %v2976_v14 = vand.u32 4294901760, %v75_v9  ;;  %v2979_v15 = vsub.f32 %v21_v1, %v2949_v4  ;;  %v2981_v16 = vand.u32 4294901760, %v78_v10  ;;  %v84_v19 = vsel %vm73_vm2, %v34_v12, 0 }
   0x5   :  { %2410 = vmatpush3.msra.mxu0 %v2962_v8  ;;  %v2987_v18 = vsub.f32 %v97_v3, %v2962_v8  ;;  %v87_v20 = vsel %vm73_vm2, %v35_v13, 0  ;;  %v3000_v24 = vsub.f32 %v81_v11, %v2983_v17  ;;  %v3007_v27 = vand.u32 4294901760, %v84_v19 }
   0x6   :  { %2411 = vmatprep.subr.mxu0 %v2905_v2  ;;  %v2993_v21 = vsub.f32 %v75_v9, %v2976_v14  ;;  %v274_v22 = vand.u32 4294901760, %v2979_v15  ;;  %v2997_v23 = vsub.f32 %v78_v10, %v2981_v16 }
   0x7   :  { %2412 = vmatpush3.msra.mxu0 %v2949_v4  ;;  %v267_v26 = vand.u32 4294901760, %v2987_v18 }
   0x8   :  { %v168_v28 = vand.u32 4294901760, %v2993_v21  ;;  %v275_v29 = vsub.f32 %v2979_v15, %v274_v22  ;;  %v178_v30 = vand.u32 4294901760, %v2997_v23  ;;  %2459 = vmatprep.subr.mxu0 %v2905_v2 }
   0x9   :  { %10 = vsyncpa [#allocation3], 0  ;;  %v268_v31 = vsub.f32 %v2987_v18, %v267_v26  ;;  %v3018_v32 = vand.u32 4294901760, %v87_v20  ;;  %v90_v33 = vsel %vm73_vm2, %v36_v25, 0  ;;  %v188_v36 = vand.u32 4294901760, %v3000_v24  ;;  %v3093_v59 = vld [vmem:[%s3888_s4 + $0x20] sm:$0xff] }
   0xa   :  { %v169_v34 = vsub.f32 %v2993_v21, %v168_v28  ;;  %v179_v35 = vsub.f32 %v2997_v23, %v178_v30  ;;  %v3029_v37 = vsub.f32 %v84_v19, %v3007_v27  ;;  %v276_v39 = vand.u32 4294901760, %v275_v29  ;;  %v37_v41 = vld [vmem:[%s3885_s1 + $0x30] sm:$0x3]  ;;  %v3105_v63 = vld [vmem:[%s3888_s4 + $0x28] sm:$0xff]  ;;  %v3114_v0 = vld [vmem:[%s3888_s4 + $0x18] sm:$0xff] }
   0xb   :  { %v269_v38 = vand.u32 4294901760, %v268_v31  ;;  %v3034_v42 = vand.u32 4294901760, %v90_v33  ;;  %v189_v44 = vsub.f32 %v3000_v24, %v188_v36  ;;  %v3042_v46 = vsub.f32 %v87_v20, %v3018_v32  ;;  %v3084_v57 = vld [vmem:[%s3888_s4 + $0x30] sm:$0x3]  ;;  %v3134_v6 = vld [vmem:[%s3888_s4 + $0x8] sm:$0xff]  ;;  %v3142_v9 = vld [vmem:[%s3888_s4] sm:$0xff] }
   0xc   :  { %v170_v40 = vand.u32 4294901760, %v169_v34  ;;  %v180_v43 = vand.u32 4294901760, %v179_v35  ;;  %v198_v45 = vand.u32 4294901760, %v3029_v37  ;;  %v93_v47 = vsel %vm73_vm2, %v37_v41, 0  ;;  %v3125_v5 = vld [vmem:[%s3888_s4 + $0x10] sm:$0xff] }
   0xd   :  { %2435 = vmatpush3.msra.mxu1 %v269_v38  ;;  %v3053_v48 = vsub.f32 %v90_v33, %v3034_v42  ;;  %v190_v49 = vand.u32 4294901760, %v189_v44  ;;  %v208_v51 = vand.u32 4294901760, %v3042_v46  ;;  %v3060_v52 = vand.u32 4294901760, %v93_v47 }
   0xe   :  { %2414 = vmatmul.mubr.f32.vlgmr.msra.gmra.mxu0 %v170_v40  ;;  %2436 = vmatprep.subr.mxu1 %v2905_v2  ;;  %v199_v50 = vsub.f32 %v3029_v37, %v198_v45  ;;  %v2907_v58 = vmov 0   ;;  %vm858_vm3 = vcmask 408576  }
   0xf   :  { %2437 = vmatpush3.msra.mxu1 %v276_v39  ;;  %2416 = vmatprep.mubr.msk.f32.mxu0 %vm2906_vm1, %v2905_v2  ;;  %v218_v53 = vand.u32 4294901760, %v3053_v48  ;;  %v209_v55 = vsub.f32 %v3042_v46, %v208_v51  ;;  %v3075_v56 = vsub.f32 %v93_v47, %v3060_v52 }
  0x10   :  { %2439 = vmatmul.mubr.f32.vlgmr.msra.gmra.mxu1 %v2976_v14  ;;  %2460 = vmatpush3.msra.mxu0 %v2987_v18  ;;  %v200_v54 = vand.u32 4294901760, %v199_v50 }
  0x11   :  { %2441 = vmatprep.mubr.msk.f32.mxu1 %vm2906_vm1, %v2905_v2  ;;  %2484 = vmatprep.subr.mxu1 %v2905_v2  ;;  %v210_v60 = vand.u32 4294901760, %v209_v55  ;;  %v219_v61 = vsub.f32 %v3053_v48, %v218_v53  ;;  %v228_v62 = vand.u32 4294901760, %v3075_v56 }
  0x12   :  { %2417 = vmatmul.mubr.f32.gmra.mxu0 %v180_v43  ;;  %2485 = vmatpush3.msra.mxu1 %v2962_v8 }
  0x13   :  { %2419 = vmatprep.mubr.msk.f32.mxu0 %vm2906_vm1, %v2905_v2  ;;  %2461 = vmatprep.subr.mxu0 %v2905_v2  ;;  %v220_v1 = vand.u32 4294901760, %v219_v61  ;;  %v229_v3 = vsub.f32 %v3075_v56, %v228_v62 }
  0x14   :  { %2442 = vmatmul.mubr.f32.gmra.mxu1 %v2981_v16  ;;  %2462 = vmatpush3.msra.mxu0 %v2979_v15 }
  0x15   :  { %2444 = vmatprep.mubr.msk.f32.mxu1 %vm2906_vm1, %v2905_v2  ;;  %2486 = vmatprep.subr.mxu1 %v2905_v2  ;;  %v230_v7 = vand.u32 4294901760, %v229_v3 }
  0x16   :  { %2420 = vmatmul.mubr.f32.gmra.mxu0 %v190_v49  ;;  %2487 = vmatpush3.msra.mxu1 %v2949_v4 }
  0x17   :  { %2422 = vmatprep.mubr.msk.f32.mxu0 %vm2906_vm1, %v2905_v2  ;;  %2509 = vmatprep.subr.mxu0 %v2905_v2 }
  0x18   :  { %2445 = vmatmul.mubr.f32.gmra.mxu1 %v2983_v17  ;;  %2534 = vmatprep.subr.mxu1 %v2905_v2 }
  0x19   :  { %2447 = vmatprep.mubr.msk.f32.mxu1 %vm2906_vm1, %v2905_v2  ;;  %2877 = vset.pattern.permute.xlu0 %v2907_v58 }
  0x1a   :  { %2423 = vmatmul.mubr.f32.gmra.mxu0 %v200_v54  ;;  %70 = vperm.xlu0 %2877, %v3084_v57  }
  0x1b   :  { %2425 = vmatprep.mubr.msk.f32.mxu0 %vm2906_vm1, %v2905_v2  ;;  %2878 = vset.pattern.permute.xlu1 %v2907_v58 }
  0x1c   :  { %2448 = vmatmul.mubr.f32.gmra.mxu1 %v3007_v27  ;;  %60 = vperm.xlu1 %2878, %v3093_v59  }
  0x1d   :  { %2450 = vmatprep.mubr.msk.f32.mxu1 %vm2906_vm1, %v2905_v2 }
  0x1e   :  { %2426 = vmatmul.mubr.f32.gmra.mxu0 %v210_v60  ;;  %65 = vperm.xlu0 %2877, %v3105_v63  }
  0x1f   :  { %2428 = vmatprep.mubr.msk.f32.mxu0 %vm2906_vm1, %v2905_v2 }
  0x20   :  { %2451 = vmatmul.mubr.f32.gmra.mxu1 %v3018_v32  ;;  %55 = vperm.xlu1 %2878, %v3114_v0  }
  0x21   :  { %2453 = vmatprep.mubr.msk.f32.mxu1 %vm2906_vm1, %v2905_v2 }
  0x22   :  { %2429 = vmatmul.mubr.f32.gmra.mxu0 %v220_v1  ;;  %50 = vperm.xlu0 %2877, %v3125_v5  }
  0x23   :  { %2431 = vmatprep.mubr.msk.f32.mxu0 %vm2906_vm1, %v2905_v2 }
  0x24   :  { %2454 = vmatmul.mubr.f32.gmra.mxu1 %v3034_v42  ;;  %45 = vperm.xlu1 %2878, %v3134_v6  }
  0x25   :  { %2456 = vmatprep.mubr.msk.f32.mxu1 %vm2906_vm1, %v2905_v2 }
  0x26   :  { %2432 = vmatmul.mubr.f32.gmra.mxu0 %v230_v7  ;;  %40 = vperm.xlu0 %2877, %v3142_v9  }
  0x27   :  { %2463 = vmatprep.mubr.msk.f32.mxu0 %vm2906_vm1, %v2905_v2 }
  0x28   :  { %2457 = vmatmul.mubr.f32.gmra.mxu1 %v3060_v52 }
  0x29   :  { %2488 = vmatprep.mubr.msk.f32.mxu1 %vm2906_vm1, %v2905_v2 }
  0x2a   :  { %2464 = vmatmul.mubr.f32.vlgmr.msra.gmra.mxu0 %v2993_v21 }
  0x2b   :  { %2466 = vmatprep.mubr.msk.f32.mxu0 %vm2906_vm1, %v2905_v2  ;;  %2510 = vmatpush3.msra.mxu0 %v267_v26 }
  0x2c   :  { %2489 = vmatmul.mubr.f32.vlgmr.msra.gmra.mxu1 %v168_v28  ;;  %2511 = vmatprep.subr.mxu0 %v2905_v2 }
  0x2d   :  { %2491 = vmatprep.mubr.msk.f32.mxu1 %vm2906_vm1, %v2905_v2  ;;  %2535 = vmatpush3.msra.mxu1 %v2962_v8 }
  0x2e   :  { %2467 = vmatmul.mubr.f32.gmra.mxu0 %v2997_v23  ;;  %2536 = vmatprep.subr.mxu1 %v2905_v2 }
  0x2f   :  { %2469 = vmatprep.mubr.msk.f32.mxu0 %vm2906_vm1, %v2905_v2  ;;  %2512 = vmatpush3.msra.mxu0 %v274_v22 }
  0x30   :  { %2492 = vmatmul.mubr.f32.gmra.mxu1 %v178_v30  ;;  %2559 = vmatprep.subr.mxu0 %v2905_v2 }
  0x31   :  { %2494 = vmatprep.mubr.msk.f32.mxu1 %vm2906_vm1, %v2905_v2  ;;  %2537 = vmatpush3.msra.mxu1 %v2949_v4 }
  0x32   :  { %2470 = vmatmul.mubr.f32.gmra.mxu0 %v3000_v24  ;;  %2594 = vmatprep.subr.mxu1 %v2905_v2 }
  0x33   :  { %2472 = vmatprep.mubr.msk.f32.mxu0 %vm2906_vm1, %v2905_v2 }
  0x34   :  { %2495 = vmatmul.mubr.f32.gmra.mxu1 %v188_v36 }
  0x35   :  { %2497 = vmatprep.mubr.msk.f32.mxu1 %vm2906_vm1, %v2905_v2 }
  0x36   :  { %2473 = vmatmul.mubr.f32.gmra.mxu0 %v3029_v37 }
  0x37   :  { %2475 = vmatprep.mubr.msk.f32.mxu0 %vm2906_vm1, %v2905_v2 }
  0x38   :  { %2498 = vmatmul.mubr.f32.gmra.mxu1 %v198_v45 }
  0x39   :  { %2500 = vmatprep.mubr.msk.f32.mxu1 %vm2906_vm1, %v2905_v2 }
  0x3a   :  { %2476 = vmatmul.mubr.f32.gmra.mxu0 %v3042_v46 }
  0x3b   :  { %2478 = vmatprep.mubr.msk.f32.mxu0 %vm2906_vm1, %v2905_v2 }
  0x3c   :  { %2501 = vmatmul.mubr.f32.gmra.mxu1 %v208_v51 }
  0x3d   :  { %2503 = vmatprep.mubr.msk.f32.mxu1 %vm2906_vm1, %v2905_v2 }
  0x3e   :  { %2479 = vmatmul.mubr.f32.gmra.mxu0 %v3053_v48 }
  0x3f   :  { %2481 = vmatprep.mubr.msk.f32.mxu0 %vm2906_vm1, %v2905_v2 }
  0x40   :  { %2504 = vmatmul.mubr.f32.gmra.mxu1 %v218_v53 }
  0x41   :  { %2506 = vmatprep.mubr.msk.f32.mxu1 %vm2906_vm1, %v2905_v2 }
  0x42   :  { %2482 = vmatmul.mubr.f32.gmra.mxu0 %v3075_v56 }
  0x43   :  { %2513 = vmatprep.mubr.msk.f32.mxu0 %vm2906_vm1, %v2905_v2 }
  0x44   :  { %2507 = vmatmul.mubr.f32.gmra.mxu1 %v228_v62 }
  0x45   :  { %2538 = vmatprep.mubr.msk.f32.mxu1 %vm2906_vm1, %v2905_v2 }
  0x46   :  { %2514 = vmatmul.mubr.f32.vlgmr.msra.gmra.mxu0 %v2976_v14 }
  0x47   :  { %2516 = vmatprep.mubr.msk.f32.mxu0 %vm2906_vm1, %v2905_v2 }
  0x48   :  { %2539 = vmatmul.mubr.f32.vlgmr.msra.gmra.mxu1 %v2976_v14 }
  0x49   :  { %2541 = vmatprep.mubr.msk.f32.mxu1 %vm2906_vm1, %v2905_v2 }
  0x4a   :  { %2517 = vmatmul.mubr.f32.gmra.mxu0 %v2981_v16 }
  0x4b   :  { %2519 = vmatprep.mubr.msk.f32.mxu0 %vm2906_vm1, %v2905_v2 }
  0x4c   :  { %2542 = vmatmul.mubr.f32.gmra.mxu1 %v2981_v16 }
  0x4d   :  { %2544 = vmatprep.mubr.msk.f32.mxu1 %vm2906_vm1, %v2905_v2 }
  0x4e   :  { %2520 = vmatmul.mubr.f32.gmra.mxu0 %v2983_v17 }
  0x4f   :  { %2522 = vmatprep.mubr.msk.f32.mxu0 %vm2906_vm1, %v2905_v2 }
  0x50   :  { %2545 = vmatmul.mubr.f32.gmra.mxu1 %v2983_v17 }
  0x51   :  { %2547 = vmatprep.mubr.msk.f32.mxu1 %vm2906_vm1, %v2905_v2 }
  0x52   :  { %2523 = vmatmul.mubr.f32.gmra.mxu0 %v3007_v27 }
  0x53   :  { %2525 = vmatprep.mubr.msk.f32.mxu0 %vm2906_vm1, %v2905_v2 }
  0x54   :  { %2548 = vmatmul.mubr.f32.gmra.mxu1 %v3007_v27 }
  0x55   :  { %2550 = vmatprep.mubr.msk.f32.mxu1 %vm2906_vm1, %v2905_v2 }
  0x56   :  { %2526 = vmatmul.mubr.f32.gmra.mxu0 %v3018_v32 }
  0x57   :  { %2528 = vmatprep.mubr.msk.f32.mxu0 %vm2906_vm1, %v2905_v2 }
  0x58   :  { %2551 = vmatmul.mubr.f32.gmra.mxu1 %v3018_v32 }
  0x59   :  { %2553 = vmatprep.mubr.msk.f32.mxu1 %vm2906_vm1, %v2905_v2 }
  0x5a   :  { %2529 = vmatmul.mubr.f32.gmra.mxu0 %v3034_v42 }
  0x5b   :  { %2531 = vmatprep.mubr.msk.f32.mxu0 %vm2906_vm1, %v2905_v2 }
  0x5c   :  { %2554 = vmatmul.mubr.f32.gmra.mxu1 %v3034_v42 }
  0x5d   :  { %2556 = vmatprep.mubr.msk.f32.mxu1 %vm2906_vm1, %v2905_v2 }
  0x5e   :  { %2532 = vmatmul.mubr.f32.gmra.mxu0 %v3060_v52 }
  0x5f   :  { %2573 = vmatprep.mubr.msk.f32.mxu0 %vm2906_vm1, %v2905_v2 }
  0x60   :  { %2557 = vmatmul.mubr.f32.gmra.mxu1 %v3060_v52 }
  0x61   :  { %2608 = vmatprep.mubr.msk.f32.mxu1 %vm2906_vm1, %v2905_v2 }
  0x95   :  { %v3255_v4 = vpop.permute.xlu0 %70 }
  0x97   :  { %v3259_v10 = vpop.permute.xlu1 %60 }
  0x99   :  { %v3257_v8 = vpop.permute.xlu0 %65 }
  0x9b   :  { %v56_v12 = vpop.permute.xlu1 %55 }
  0x9d   :  { %v51_v11 = vpop.permute.xlu0 %50 }
  0x9f   :  { %v46_v16 = vpop.permute.xlu1 %45 }
  0xa1   :  { %v41_v13 = vpop.permute.xlu0 %40 }
  0xce   :  { %v172_v14 = vpop.f32.mrf.mxu0 }
  0xcf   :  { %v173_v15 = vadd.f32 %v172_v14, %v41_v13 }
  0xd0   :  { %v2415_v17 = vpop.f32.mrf.mxu0  ;;  %v313_v18 = vpop.f32.mrf.mxu1 }
  0xd1   :  { %v3261_v19 = vadd.f32 %v313_v18, %v173_v15 }
  0xd2   :  { %v182_v20 = vpop.f32.mrf.mxu0  ;;  %v2440_v21 = vpop.f32.mrf.mxu1 }
  0xd3   :  { %v183_v22 = vadd.f32 %v182_v20, %v46_v16  ;;  %v2908_v20 = vmov 1  }
  0xd4   :  { %v2418_v23 = vpop.f32.mrf.mxu0  ;;  %v319_v24 = vpop.f32.mrf.mxu1  ;;  %2879 = vset.pattern.permute.xlu1 %v2908_v20  ;;  %2880 = vset.pattern.permute.xlu0 %v2908_v20 }
  0xd5   :  { %v3263_v25 = vadd.f32 %v319_v24, %v183_v22  ;;  %855 = vperm.xlu1 %2879, %v3084_v57   ;;  %851 = vperm.xlu0 %2880, %v3105_v63  }
  0xd6   :  { %v192_v26 = vpop.f32.mrf.mxu0  ;;  %v2443_v27 = vpop.f32.mrf.mxu1 }
  0xd7   :  { %v193_v28 = vadd.f32 %v192_v26, %v51_v11 }
  0xd8   :  { %v2421_v29 = vpop.f32.mrf.mxu0  ;;  %v325_v30 = vpop.f32.mrf.mxu1 }
  0xd9   :  { %v3265_v31 = vadd.f32 %v325_v30, %v193_v28  ;;  %847 = vperm.xlu1 %2879, %v3093_v59   ;;  %839 = vperm.xlu0 %2880, %v3125_v5  }
  0xda   :  { %v202_v32 = vpop.f32.mrf.mxu0  ;;  %v2446_v33 = vpop.f32.mrf.mxu1 }
  0xdb   :  { %v203_v34 = vadd.f32 %v202_v32, %v56_v12 }
  0xdc   :  { %v2424_v35 = vpop.f32.mrf.mxu0  ;;  %v331_v36 = vpop.f32.mrf.mxu1 }
  0xdd   :  { %v3267_v37 = vadd.f32 %v331_v36, %v203_v34  ;;  %843 = vperm.xlu1 %2879, %v3114_v0   ;;  %831 = vperm.xlu0 %2880, %v3142_v9  }
  0xde   :  { %v212_v38 = vpop.f32.mrf.mxu0  ;;  %v2449_v39 = vpop.f32.mrf.mxu1 }
  0xdf   :  { %v213_v33 = vadd.f32 %v212_v38, %v3259_v10 }
  0xe0   :  { %v2427_v40 = vpop.f32.mrf.mxu0  ;;  %v337_v41 = vpop.f32.mrf.mxu1 }
  0xe1   :  { %835 = vperm.xlu1 %2879, %v3134_v6   ;;  %v338_v36 = vadd.f32 %v337_v41, %v213_v33 }
  0xe2   :  { %v222_v42 = vpop.f32.mrf.mxu0  ;;  %v2452_v43 = vpop.f32.mrf.mxu1 }
  0xe3   :  { %v223_v39 = vadd.f32 %v222_v42, %v3257_v8 }
  0xe4   :  { %v2430_v44 = vpop.f32.mrf.mxu0  ;;  %v343_v45 = vpop.f32.mrf.mxu1 }
  0xe6   :  { %v232_v46 = vpop.f32.mrf.mxu0  ;;  %v2455_v47 = vpop.f32.mrf.mxu1 }
  0xe8   :  { %v2433_v48 = vpop.f32.mrf.mxu0  ;;  %v3269_v49 = vpop.f32.mrf.mxu1 }
  0xe9   :  { %v344_v48 = vadd.f32 %v343_v45, %v223_v39 }
  0xea   :  { %v3271_v50 = vpop.f32.mrf.mxu0  ;;  %v2458_v51 = vpop.f32.mrf.mxu1 }
  0xeb   :  { %v233_v51 = vadd.f32 %v232_v46, %v3255_v4 }
  0xec   :  { %v2465_v52 = vpop.f32.mrf.mxu0  ;;  %v3273_v53 = vpop.f32.mrf.mxu1 }
  0xed   :  { %v350_v8 = vadd.f32 %v3269_v49, %v233_v51 }
  0xee   :  { %v3275_v54 = vpop.f32.mrf.mxu0  ;;  %v2490_v55 = vpop.f32.mrf.mxu1 }
  0xef   :  { %v433_v42 = vadd.f32 %v3275_v54, %v3263_v25  ;;  %v823_v25 = vld [vmem:[%s3886_s2] sm:$0xff] }
  0xf0   :  { %v2468_v56 = vpop.f32.mrf.mxu0  ;;  %v3277_v58 = vpop.f32.mrf.mxu1 }
  0xf2   :  { %v439_v60 = vpop.f32.mrf.mxu0  ;;  %v2493_v61 = vpop.f32.mrf.mxu1 }
  0xf3   :  { %v440_v6 = vadd.f32 %v439_v60, %v3265_v31  ;;  %v426_v31 = vadd.f32 %v3271_v50, %v3261_v19 }
  0xf4   :  { %v2471_v62 = vpop.f32.mrf.mxu0  ;;  %v558_v1 = vpop.f32.mrf.mxu1 }
  0xf5   :  { %v543_v19 = vadd.f32 %v3273_v53, %v426_v31 }
  0xf6   :  { %v446_v3 = vpop.f32.mrf.mxu0  ;;  %v2496_v7 = vpop.f32.mrf.mxu1 }
  0xf7   :  { %v447_v9 = vadd.f32 %v446_v3, %v3267_v37  ;;  %v559_v7 = vadd.f32 %v558_v1, %v440_v6 }
  0xf8   :  { %v2474_v11 = vpop.f32.mrf.mxu0  ;;  %v566_v12 = vpop.f32.mrf.mxu1 }
  0xf9   :  { %v567_v56 = vadd.f32 %v566_v12, %v447_v9 }
  0xfa   :  { %v453_v13 = vpop.f32.mrf.mxu0  ;;  %v2499_v14 = vpop.f32.mrf.mxu1 }
  0xfb   :  { %v454_v43 = vadd.f32 %v453_v13, %v338_v36  ;;  %v551_v13 = vadd.f32 %v3277_v58, %v433_v42  ;;  %v860_v58 = vsel %vm858_vm3, %v823_v25, 0 }
  0xfc   :  { %v2477_v15 = vpop.f32.mrf.mxu0  ;;  %v574_v16 = vpop.f32.mrf.mxu1 }
  0xfd   :  { %v575_v52 = vadd.f32 %v574_v16, %v454_v43 }
  0xfe   :  { %v460_v17 = vpop.f32.mrf.mxu0  ;;  %v2502_v18 = vpop.f32.mrf.mxu1 }
  0xff   :  { %v461_v55 = vadd.f32 %v460_v17, %v344_v48 }
 0x100   :  { %v2480_v21 = vpop.f32.mrf.mxu0  ;;  %v582_v22 = vpop.f32.mrf.mxu1 }
 0x101   :  { %v583_v4 = vadd.f32 %v582_v22, %v461_v55 }
 0x102   :  { %v467_v23 = vpop.f32.mrf.mxu0  ;;  %v2505_v24 = vpop.f32.mrf.mxu1 }
 0x103   :  { %v468_v46 = vadd.f32 %v467_v23, %v350_v8 }
 0x104   :  { %v2483_v26 = vpop.f32.mrf.mxu0  ;;  %v590_v27 = vpop.f32.mrf.mxu1 }
 0x105   :  { %v591_v16 = vadd.f32 %v590_v27, %v468_v46  ;;  %v824_v27 = vld [vmem:[%s3886_s2 + $0x8] sm:$0xff] }
 0x106   :  { %v3283_v28 = vpop.f32.mrf.mxu0  ;;  %v2508_v29 = vpop.f32.mrf.mxu1 }
 0x107   :  { %v668_v26 = vadd.f32 %v3283_v28, %v543_v19  ;;  %v863_v28 = vsel %vm858_vm3, %v824_v27, 0 }
 0x108   :  { %v2515_v57 = vpop.f32.mrf.mxu0  ;;  %v3287_v30 = vpop.f32.mrf.mxu1 }
 0x10a   :  { %v673_v63 = vpop.f32.mrf.mxu0  ;;  %v2540_v32 = vpop.f32.mrf.mxu1 }
 0x10b   :  { %v674_v17 = vadd.f32 %v673_v63, %v551_v13 }
 0x10c   :  { %v2518_v59 = vpop.f32.mrf.mxu0  ;;  %v782_v5 = vpop.f32.mrf.mxu1 }
 0x10d   :  { %v783_v63 = vadd.f32 %v782_v5, %v674_v17  ;;  %v3312_v59 = vand.u32 4294901760, %v860_v58  ;;  %v825_v5 = vld [vmem:[%s3886_s2 + $0x10] sm:$0xff]  ;;  %v827_v17 = vld [vmem:[%s3886_s2 + $0x20] sm:$0xff] }
 0x10e   :  { %v679_v34 = vpop.f32.mrf.mxu0  ;;  %v2543_v35 = vpop.f32.mrf.mxu1 }
 0x10f   :  { %v680_v14 = vadd.f32 %v679_v34, %v559_v7  ;;  %v817_v9 = vmax.f32 %v783_v63, 0.0 }
 0x110   :  { %v2521_v40 = vpop.f32.mrf.mxu0  ;;  %v788_v0 = vpop.f32.mrf.mxu1 }
 0x111   :  { %v789_v22 = vadd.f32 %v788_v0, %v680_v14  ;;  %v777_v40 = vadd.f32 %v3287_v30, %v668_v26  ;;  %v3335_v30 = vand.u32 4294901760, %v863_v28 }
 0x112   :  { %v685_v44 = vpop.f32.mrf.mxu0  ;;  %v2546_v47 = vpop.f32.mrf.mxu1 }
 0x113   :  { %v686_v62 = vadd.f32 %v685_v44, %v567_v56  ;;  %v818_v36 = vmax.f32 %v789_v22, 0.0  ;;  %v3328_v47 = vsub.f32 %v860_v58, %v3312_v59  ;;  %v816_v6 = vmax.f32 %v777_v40, 0.0 }
 0x114   :  { %v2524_v10 = vpop.f32.mrf.mxu0  ;;  %v794_v38 = vpop.f32.mrf.mxu1 }
 0x115   :  { %v795_v54 = vadd.f32 %v794_v38, %v686_v62  ;;  %v3337_v10 = vand.u32 4294901760, %v818_v36  ;;  %v866_v38 = vsel %vm858_vm3, %v825_v5, 0  ;;  %v3367_v7 = vand.u32 4294901760, %v816_v6 }
 0x116   :  { %v691_v41 = vpop.f32.mrf.mxu0  ;;  %v2549_v61 = vpop.f32.mrf.mxu1 }
 0x117   :  { %v692_v37 = vadd.f32 %v691_v41, %v575_v52  ;;  %v819_v29 = vmax.f32 %v795_v54, 0.0  ;;  %v3348_v41 = vand.u32 4294901760, %v817_v9  ;;  %v957_v61 = vand.u32 4294901760, %v3328_v47 }
 0x118   :  { %v2527_v3 = vpop.f32.mrf.mxu0  ;;  %v800_v45 = vpop.f32.mrf.mxu1  ;;  %v3359_v62 = vsub.f32 %v818_v36, %v3337_v10 }
 0x119   :  { %v801_v60 = vadd.f32 %v800_v45, %v692_v37  ;;  %v3318_v0 = vand.u32 4294901760, %v819_v29  ;;  %v3356_v37 = vsub.f32 %v863_v28, %v3335_v30  ;;  %v3362_v3 = vand.u32 4294901760, %v866_v38  ;;  %v826_v45 = vld [vmem:[%s3886_s2 + $0x18] sm:$0xff]  ;;  %v829_v28 = vld [vmem:[%s3886_s2 + $0x30] sm:$0x3] }
 0x11a   :  { %v697_v11 = vpop.f32.mrf.mxu0  ;;  %v2552_v12 = vpop.f32.mrf.mxu1  ;;  %v1074_v25 = vand.u32 4294901760, %v3359_v62 }
 0x11b   :  { %v698_v49 = vadd.f32 %v697_v11, %v583_v4  ;;  %v820_v50 = vmax.f32 %v801_v60, 0.0  ;;  %v3341_v52 = vsub.f32 %v819_v29, %v3318_v0  ;;  %v3378_v60 = vsub.f32 %v817_v9, %v3348_v41  ;;  %v828_v29 = vld [vmem:[%s3886_s2 + $0x28] sm:$0xff] }
 0x11c   :  { %v2530_v15 = vpop.f32.mrf.mxu0  ;;  %v806_v1 = vpop.f32.mrf.mxu1  ;;  %v958_v11 = vsub.f32 %v3328_v47, %v957_v61  ;;  %v967_v14 = vand.u32 4294901760, %v3356_v37  ;;  %v3393_v54 = vsub.f32 %v866_v38, %v3362_v3  ;;  %v1075_v58 = vsub.f32 %v3359_v62, %v1074_v25 }
 0x11d   :  { %v807_v18 = vadd.f32 %v806_v1, %v698_v49  ;;  %v3314_v34 = vand.u32 4294901760, %v820_v50  ;;  %v1067_v4 = vand.u32 4294901760, %v3341_v52  ;;  %v869_v49 = vsel %vm858_vm3, %v826_v45, 0 }
 0x11e   :  { %v703_v20 = vpop.f32.mrf.mxu0  ;;  %v2555_v21 = vpop.f32.mrf.mxu1  ;;  %v3396_v15 = vsub.f32 %v816_v6, %v3367_v7  ;;  %v959_v19 = vand.u32 4294901760, %v958_v11  ;;  %v977_v22 = vand.u32 4294901760, %v3393_v54  ;;  %v875_v36 = vsel %vm858_vm3, %v828_v29, 0 }
 0x11f   :  { %v821_v23 = vmax.f32 %v807_v18, 0.0  ;;  %v704_v24 = vadd.f32 %v703_v20, %v591_v16  ;;  %v3331_v48 = vsub.f32 %v820_v50, %v3314_v34  ;;  %v1068_v1 = vsub.f32 %v3341_v52, %v1067_v4 }
 0x120   :  { %v2533_v57 = vpop.f32.mrf.mxu0  ;;  %v812_v32 = vpop.f32.mrf.mxu1  ;;  %v1081_v18 = vand.u32 4294901760, %v3378_v60  ;;  %v3408_v50 = vand.u32 4294901760, %v869_v49  ;;  %v968_v21 = vsub.f32 %v3356_v37, %v967_v14  ;;  %v878_v6 = vsel %vm858_vm3, %v829_v28, 0 }
 0x121   :  { %v3310_v33 = vand.u32 4294901760, %v821_v23  ;;  %v813_v53 = vadd.f32 %v812_v32, %v704_v24  ;;  %v1060_v8 = vand.u32 4294901760, %v3331_v48  ;;  %v1088_v24 = vand.u32 4294901760, %v3396_v15 }
 0x122   :  { %v2558_v35 = vpop.f32.mrf.mxu1  ;;  %v1069_v26 = vand.u32 4294901760, %v1068_v1  ;;  %v1082_v57 = vsub.f32 %v3378_v60, %v1081_v18  ;;  %v3431_v32 = vsub.f32 %v869_v49, %v3408_v50  ;;  %v969_v27 = vand.u32 4294901760, %v968_v21 }
 0x123   :  { %v822_v39 = vmax.f32 %v813_v53, 0.0  ;;  %v3321_v43 = vsub.f32 %v821_v23, %v3310_v33  ;;  %v1061_v12 = vsub.f32 %v3331_v48, %v1060_v8  ;;  %v872_v23 = vsel %vm858_vm3, %v827_v17, 0 }
 0x124   :  { %v3434_v63 = vand.u32 4294901760, %v872_v23  ;;  %v1076_v53 = vand.u32 4294901760, %v1075_v58  ;;  %v978_v35 = vsub.f32 %v3393_v54, %v977_v22  ;;  %v1083_v40 = vand.u32 4294901760, %v1082_v57 }
 0x125   :  { %v881_v44 = vsel %vm95_vm0, %v822_v39, 0  ;;  %v1053_v55 = vand.u32 4294901760, %v3321_v43  ;;  %v1062_v20 = vand.u32 4294901760, %v1061_v12  ;;  %v1089_v39 = vsub.f32 %v3396_v15, %v1088_v24 }
 0x126   :  { %v3333_v51 = vand.u32 4294901760, %v881_v44  ;;  %v987_v5 = vand.u32 4294901760, %v3431_v32  ;;  %v3455_v9 = vsub.f32 %v872_v23, %v3434_v63  ;;  %v979_v38 = vand.u32 4294901760, %v978_v35 }
 0x127   :  { %v1054_v46 = vsub.f32 %v3321_v43, %v1053_v55  ;;  %v1090_v45 = vand.u32 4294901760, %v1089_v39  ;;  %v3474_v12 = vand.u32 4294901760, %v878_v6 }
 0x128   :  { %v3345_v56 = vsub.f32 %v881_v44, %v3333_v51  ;;  %2560 = vmatpush3.msra.mxu0 %v3333_v51  ;;  %v3457_v44 = vand.u32 4294901760, %v875_v36 }
 0x129   :  { %2561 = vmatprep.subr.mxu0 %v2905_v2  ;;  %v1055_v16 = vand.u32 4294901760, %v1054_v46  ;;  %v988_v46 = vsub.f32 %v3431_v32, %v987_v5 }
 0x12a   :  { %v1046_v42 = vand.u32 4294901760, %v3345_v56  ;;  %2562 = vmatpush3.msra.mxu0 %v3310_v33  ;;  %v3472_v11 = vsub.f32 %v875_v36, %v3457_v44 }
 0x12b   :  { %2563 = vmatprep.subr.mxu0 %v2905_v2 }
 0x12c   :  { %2564 = vmatpush3.msra.mxu0 %v3314_v34  ;;  %v1047_v31 = vsub.f32 %v3345_v56, %v1046_v42  ;;  %v1007_v1 = vand.u32 4294901760, %v3472_v11 }
 0x12d   :  { %2565 = vmatprep.subr.mxu0 %v2905_v2 }
 0x12e   :  { %2566 = vmatpush3.msra.mxu0 %v3318_v0  ;;  %v1048_v13 = vand.u32 4294901760, %v1047_v31  ;;  %v997_v31 = vand.u32 4294901760, %v3455_v9 }
 0x12f   :  { %2567 = vmatprep.subr.mxu0 %v2905_v2 }
 0x130   :  { %2568 = vmatpush3.msra.mxu0 %v3337_v10  ;;  %2595 = vmatpush3.msra.mxu1 %v1048_v13  ;;  %v989_v13 = vand.u32 4294901760, %v988_v46  ;;  %v998_v49 = vsub.f32 %v3455_v9, %v997_v31 }
 0x131   :  { %2569 = vmatprep.subr.mxu0 %v2905_v2  ;;  %2596 = vmatprep.subr.mxu1 %v2905_v2 }
 0x132   :  { %2570 = vmatpush3.msra.mxu0 %v3348_v41  ;;  %2597 = vmatpush3.msra.mxu1 %v1055_v16  ;;  %v3488_v16 = vsub.f32 %v878_v6, %v3474_v12  ;;  %v999_v17 = vand.u32 4294901760, %v998_v49 }
 0x133   :  { %2571 = vmatprep.subr.mxu0 %v2905_v2  ;;  %2598 = vmatprep.subr.mxu1 %v2905_v2 }
 0x134   :  { %2572 = vmatpush3.msra.mxu0 %v3367_v7  ;;  %2599 = vmatpush3.msra.mxu1 %v1062_v20  ;;  %v1017_v20 = vand.u32 4294901760, %v3488_v16 }
 0x135   :  { %2574 = vmatmul.mubr.f32.vlgmr.msra.gmra.mxu0 %v959_v19  ;;  %2600 = vmatprep.subr.mxu1 %v2905_v2  ;;  %v1008_v19 = vsub.f32 %v3472_v11, %v1007_v1 }
 0x136   :  { %2629 = vmatprep.subr.mxu0 %v2905_v2  ;;  %2601 = vmatpush3.msra.mxu1 %v1069_v26  ;;  %v1018_v58 = vsub.f32 %v3488_v16, %v1017_v20 }
 0x137   :  { %2630 = vmatpush3.msra.mxu0 %v3345_v56  ;;  %2602 = vmatprep.subr.mxu1 %v2905_v2  ;;  %v1009_v21 = vand.u32 4294901760, %v1008_v19 }
 0x138   :  { %2631 = vmatprep.subr.mxu0 %v2905_v2  ;;  %2576 = vmatprep.mubr.msk.f32.mxu0 %vm2906_vm1, %v2905_v2  ;;  %v1019_v23 = vand.u32 4294901760, %v1018_v58 }
 0x139   :  { %2603 = vmatpush3.msra.mxu1 %v1076_v53  ;;  %2632 = vmatpush3.msra.mxu0 %v3321_v43  ;;  %v2909_v53 = vmov 2  }
 0x13a   :  { %2577 = vmatmul.mubr.f32.gmra.mxu0 %v969_v27  ;;  %2604 = vmatprep.subr.mxu1 %v2905_v2  ;;  %v30_v27 = vld [vmem:[%s3888_s4] sm:$0x1] }
 0x13b   :  { %2633 = vmatprep.subr.mxu0 %v2905_v2  ;;  %2605 = vmatpush3.msra.mxu1 %v1083_v40 }
 0x13c   :  { %2634 = vmatpush3.msra.mxu0 %v3331_v48  ;;  %2606 = vmatprep.subr.mxu1 %v2905_v2 }
 0x13d   :  { %2635 = vmatprep.subr.mxu0 %v2905_v2  ;;  %2579 = vmatprep.mubr.msk.f32.mxu0 %vm2906_vm1, %v2905_v2 }
 0x13e   :  { %2607 = vmatpush3.msra.mxu1 %v1090_v45  ;;  %2636 = vmatpush3.msra.mxu0 %v3341_v52 }
 0x13f   :  { %2580 = vmatmul.mubr.f32.gmra.mxu0 %v979_v38  ;;  %2609 = vmatmul.mubr.f32.vlgmr.msra.gmra.mxu1 %v3312_v59 }
 0x140   :  { %2637 = vmatprep.subr.mxu0 %v2905_v2  ;;  %2664 = vmatprep.subr.mxu1 %v2905_v2 }
 0x141   :  { %2638 = vmatpush3.msra.mxu0 %v3359_v62  ;;  %2665 = vmatpush3.msra.mxu1 %v3333_v51 }
 0x142   :  { %2639 = vmatprep.subr.mxu0 %v2905_v2  ;;  %2666 = vmatprep.subr.mxu1 %v2905_v2 }
 0x143   :  { %2582 = vmatprep.mubr.msk.f32.mxu0 %vm2906_vm1, %v2905_v2  ;;  %2611 = vmatprep.mubr.msk.f32.mxu1 %vm2906_vm1, %v2905_v2 }
 0x144   :  { %2640 = vmatpush3.msra.mxu0 %v3378_v60  ;;  %2667 = vmatpush3.msra.mxu1 %v3310_v33 }
 0x145   :  { %2583 = vmatmul.mubr.f32.gmra.mxu0 %v989_v13  ;;  %2612 = vmatmul.mubr.f32.gmra.mxu1 %v3335_v30 }
 0x146   :  { %2641 = vmatprep.subr.mxu0 %v2905_v2  ;;  %2668 = vmatprep.subr.mxu1 %v2905_v2 }
 0x147   :  { %2642 = vmatpush3.msra.mxu0 %v3396_v15  ;;  %2669 = vmatpush3.msra.mxu1 %v3314_v34 }
 0x148   :  { %2670 = vmatprep.subr.mxu1 %v2905_v2  ;;  %2585 = vmatprep.mubr.msk.f32.mxu0 %vm2906_vm1, %v2905_v2 }
 0x149   :  { %2614 = vmatprep.mubr.msk.f32.mxu1 %vm2906_vm1, %v2905_v2  ;;  %2671 = vmatpush3.msra.mxu1 %v3318_v0 }
 0x14a   :  { %2586 = vmatmul.mubr.f32.gmra.mxu0 %v999_v17  ;;  %2615 = vmatmul.mubr.f32.gmra.mxu1 %v3362_v3 }
 0x14b   :  { %2672 = vmatprep.subr.mxu1 %v2905_v2  ;;  %2588 = vmatprep.mubr.msk.f32.mxu0 %vm2906_vm1, %v2905_v2 }
 0x14c   :  { %2673 = vmatpush3.msra.mxu1 %v3337_v10  ;;  %2617 = vmatprep.mubr.msk.f32.mxu1 %vm2906_vm1, %v2905_v2 }
 0x14d   :  { %2674 = vmatprep.subr.mxu1 %v2905_v2  ;;  %2699 = vmatprep.subr.mxu0 %v2905_v2 }
 0x14e   :  { %2675 = vmatpush3.msra.mxu1 %v3348_v41  ;;  %2589 = vmatmul.mubr.f32.gmra.mxu0 %v1009_v21 }
 0x14f   :  { %2618 = vmatmul.mubr.f32.gmra.mxu1 %v3408_v50  ;;  %2676 = vmatprep.subr.mxu1 %v2905_v2 }
 0x150   :  { %2677 = vmatpush3.msra.mxu1 %v3367_v7  ;;  %2591 = vmatprep.mubr.msk.f32.mxu0 %vm2906_vm1, %v2905_v2 }
 0x151   :  { %2620 = vmatprep.mubr.msk.f32.mxu1 %vm2906_vm1, %v2905_v2  ;;  %2734 = vmatprep.subr.mxu1 %v2905_v2 }
 0x152   :  { %2592 = vmatmul.mubr.f32.gmra.mxu0 %v1019_v23  ;;  %2881 = vset.pattern.permute.xlu1 %v2909_v53 }
 0x153   :  { %2621 = vmatmul.mubr.f32.gmra.mxu1 %v3434_v63  ;;  %2643 = vmatprep.mubr.msk.f32.mxu0 %vm2906_vm1, %v2905_v2 }
 0x154   :  { %2623 = vmatprep.mubr.msk.f32.mxu1 %vm2906_vm1, %v2905_v2  ;;  %2882 = vset.pattern.permute.xlu0 %v2909_v53 }
 0x155   :  { %1675 = vperm.xlu1 %2881, %v30_v27  }
 0x156   :  { %2644 = vmatmul.mubr.f32.vlgmr.msra.gmra.mxu0 %v3328_v47 }
 0x157   :  { %2624 = vmatmul.mubr.f32.gmra.mxu1 %v3457_v44  ;;  %2700 = vmatpush3.msra.mxu0 %v1046_v42 }
 0x158   :  { %2701 = vmatprep.subr.mxu0 %v2905_v2  ;;  %2626 = vmatprep.mubr.msk.f32.mxu1 %vm2906_vm1, %v2905_v2 }
 0x159   :  { %2702 = vmatpush3.msra.mxu0 %v1053_v55  ;;  %2646 = vmatprep.mubr.msk.f32.mxu0 %vm2906_vm1, %v2905_v2 }
 0x15a   :  { %2703 = vmatprep.subr.mxu0 %v2905_v2  ;;  %2647 = vmatmul.mubr.f32.gmra.mxu0 %v3356_v37 }
 0x15b   :  { %2627 = vmatmul.mubr.f32.gmra.mxu1 %v3474_v12  ;;  %2704 = vmatpush3.msra.mxu0 %v1060_v8 }
 0x15c   :  { %2705 = vmatprep.subr.mxu0 %v2905_v2  ;;  %2649 = vmatprep.mubr.msk.f32.mxu0 %vm2906_vm1, %v2905_v2 }
 0x15d   :  { %2706 = vmatpush3.msra.mxu0 %v1067_v4  ;;  %2678 = vmatprep.mubr.msk.f32.mxu1 %vm2906_vm1, %v2905_v2 }
 0x15e   :  { %2707 = vmatprep.subr.mxu0 %v2905_v2  ;;  %2650 = vmatmul.mubr.f32.gmra.mxu0 %v3393_v54 }
 0x15f   :  { %2679 = vmatmul.mubr.f32.vlgmr.msra.gmra.mxu1 %v957_v61  ;;  %2708 = vmatpush3.msra.mxu0 %v1074_v25 }
 0x160   :  { %2735 = vmatpush3.msra.mxu1 %v3333_v51  ;;  %2709 = vmatprep.subr.mxu0 %v2905_v2 }
 0x161   :  { %2736 = vmatprep.subr.mxu1 %v2905_v2  ;;  %2710 = vmatpush3.msra.mxu0 %v1081_v18 }
 0x162   :  { %2737 = vmatpush3.msra.mxu1 %v3310_v33  ;;  %2652 = vmatprep.mubr.msk.f32.mxu0 %vm2906_vm1, %v2905_v2  ;;  %v3669_v33 = vpop.permute.xlu1 %855 }
 0x163   :  { %2681 = vmatprep.mubr.msk.f32.mxu1 %vm2906_vm1, %v2905_v2  ;;  %2711 = vmatprep.subr.mxu0 %v2905_v2 }
 0x164   :  { %2738 = vmatprep.subr.mxu1 %v2905_v2  ;;  %2653 = vmatmul.mubr.f32.gmra.mxu0 %v3431_v32 }
 0x165   :  { %2682 = vmatmul.mubr.f32.gmra.mxu1 %v967_v14  ;;  %2712 = vmatpush3.msra.mxu0 %v1088_v24 }
 0x166   :  { %2739 = vmatpush3.msra.mxu1 %v3314_v34  ;;  %2655 = vmatprep.mubr.msk.f32.mxu0 %vm2906_vm1, %v2905_v2  ;;  %v3673_v34 = vpop.permute.xlu1 %847 }
 0x167   :  { %2740 = vmatprep.subr.mxu1 %v2905_v2  ;;  %2684 = vmatprep.mubr.msk.f32.mxu1 %vm2906_vm1, %v2905_v2 }
 0x168   :  { %2741 = vmatpush3.msra.mxu1 %v3318_v0  ;;  %2656 = vmatmul.mubr.f32.gmra.mxu0 %v3455_v9 }
 0x169   :  { %2742 = vmatprep.subr.mxu1 %v2905_v2  ;;  %2685 = vmatmul.mubr.f32.gmra.mxu1 %v977_v22 }
 0x16a   :  { %2743 = vmatpush3.msra.mxu1 %v3337_v10  ;;  %2658 = vmatprep.mubr.msk.f32.mxu0 %vm2906_vm1, %v2905_v2  ;;  %v844_v48 = vpop.permute.xlu1 %843 }
 0x16b   :  { %2744 = vmatprep.subr.mxu1 %v2905_v2  ;;  %2687 = vmatprep.mubr.msk.f32.mxu1 %vm2906_vm1, %v2905_v2 }
 0x16c   :  { %2745 = vmatpush3.msra.mxu1 %v3348_v41  ;;  %2659 = vmatmul.mubr.f32.gmra.mxu0 %v3472_v11 }
 0x16d   :  { %2746 = vmatprep.subr.mxu1 %v2905_v2  ;;  %2688 = vmatmul.mubr.f32.gmra.mxu1 %v987_v5 }
 0x16e   :  { %2747 = vmatpush3.msra.mxu1 %v3367_v7  ;;  %2661 = vmatprep.mubr.msk.f32.mxu0 %vm2906_vm1, %v2905_v2  ;;  %v836_v55 = vpop.permute.xlu1 %835 }
 0x16f   :  { %2690 = vmatprep.mubr.msk.f32.mxu1 %vm2906_vm1, %v2905_v2  ;;  %2769 = vmatprep.subr.mxu0 %v2905_v2 }
 0x170   :  { %2662 = vmatmul.mubr.f32.gmra.mxu0 %v3488_v16  ;;  %2786 = vmatprep.subr.mxu1 %v2905_v2 }
 0x171   :  { %2691 = vmatmul.mubr.f32.gmra.mxu1 %v997_v31  ;;  %2713 = vmatprep.mubr.msk.f32.mxu0 %vm2906_vm1, %v2905_v2 }
 0x172   :  { %2693 = vmatprep.mubr.msk.f32.mxu1 %vm2906_vm1, %v2905_v2 }
 0x174   :  { %2714 = vmatmul.mubr.f32.vlgmr.msra.gmra.mxu0 %v3312_v59 }
 0x175   :  { %2694 = vmatmul.mubr.f32.gmra.mxu1 %v1007_v1  ;;  %2716 = vmatprep.mubr.msk.f32.mxu0 %vm2906_vm1, %v2905_v2 }
 0x176   :  { %2696 = vmatprep.mubr.msk.f32.mxu1 %vm2906_vm1, %v2905_v2 }
 0x178   :  { %2717 = vmatmul.mubr.f32.gmra.mxu0 %v3335_v30 }
 0x179   :  { %2697 = vmatmul.mubr.f32.gmra.mxu1 %v1017_v20  ;;  %2719 = vmatprep.mubr.msk.f32.mxu0 %vm2906_vm1, %v2905_v2 }
 0x17a   :  { %2748 = vmatprep.mubr.msk.f32.mxu1 %vm2906_vm1, %v2905_v2 }
 0x17c   :  { %2720 = vmatmul.mubr.f32.gmra.mxu0 %v3362_v3 }
 0x17d   :  { %2749 = vmatmul.mubr.f32.vlgmr.msra.gmra.mxu1 %v3312_v59  ;;  %2722 = vmatprep.mubr.msk.f32.mxu0 %vm2906_vm1, %v2905_v2  ;;  %v3671_v59 = vpop.permute.xlu0 %851 }
 0x17e   :  { %2751 = vmatprep.mubr.msk.f32.mxu1 %vm2906_vm1, %v2905_v2 }
 0x180   :  { %2723 = vmatmul.mubr.f32.gmra.mxu0 %v3408_v50 }
 0x181   :  { %2752 = vmatmul.mubr.f32.gmra.mxu1 %v3335_v30  ;;  %2725 = vmatprep.mubr.msk.f32.mxu0 %vm2906_vm1, %v2905_v2  ;;  %v840_v0 = vpop.permute.xlu0 %839 }
 0x182   :  { %2754 = vmatprep.mubr.msk.f32.mxu1 %vm2906_vm1, %v2905_v2 }
 0x184   :  { %2726 = vmatmul.mubr.f32.gmra.mxu0 %v3434_v63 }
 0x185   :  { %2755 = vmatmul.mubr.f32.gmra.mxu1 %v3362_v3  ;;  %2728 = vmatprep.mubr.msk.f32.mxu0 %vm2906_vm1, %v2905_v2  ;;  %v832_v51 = vpop.permute.xlu0 %831 }
 0x186   :  { %2757 = vmatprep.mubr.msk.f32.mxu1 %vm2906_vm1, %v2905_v2 }
 0x188   :  { %2729 = vmatmul.mubr.f32.gmra.mxu0 %v3457_v44 }
 0x189   :  { %2758 = vmatmul.mubr.f32.gmra.mxu1 %v3408_v50  ;;  %2731 = vmatprep.mubr.msk.f32.mxu0 %vm2906_vm1, %v2905_v2 }
 0x18a   :  { %2760 = vmatprep.mubr.msk.f32.mxu1 %vm2906_vm1, %v2905_v2 }
 0x18c   :  { %2732 = vmatmul.mubr.f32.gmra.mxu0 %v3474_v12 }
 0x18d   :  { %2761 = vmatmul.mubr.f32.gmra.mxu1 %v3434_v63  ;;  %2783 = vmatprep.mubr.msk.f32.mxu0 %vm2906_vm1, %v2905_v2 }
 0x18e   :  { %2763 = vmatprep.mubr.msk.f32.mxu1 %vm2906_vm1, %v2905_v2 }
 0x191   :  { %2764 = vmatmul.mubr.f32.gmra.mxu1 %v3457_v44 }
 0x192   :  { %2766 = vmatprep.mubr.msk.f32.mxu1 %vm2906_vm1, %v2905_v2 }
 0x195   :  { %2767 = vmatmul.mubr.f32.gmra.mxu1 %v3474_v12 }
 0x196   :  { %2800 = vmatprep.mubr.msk.f32.mxu1 %vm2906_vm1, %v2905_v2 }
 0x1f5   :  { %v961_v43 = vpop.f32.mrf.mxu0 }
 0x1f6   :  { %v962_v52 = vadd.f32 %v961_v43, %v832_v51 }
 0x1f7   :  { %v2575_v47 = vpop.f32.mrf.mxu0 }
 0x1fa   :  { %v971_v30 = vpop.f32.mrf.mxu0 }
 0x1fb   :  { %v972_v37 = vadd.f32 %v971_v30, %v836_v55 }
 0x1fc   :  { %v2578_v10 = vpop.f32.mrf.mxu0 }
 0x1ff   :  { %v981_v56 = vpop.f32.mrf.mxu0  ;;  %v1127_v41 = vpop.f32.mrf.mxu1 }
 0x200   :  { %v1128_v61 = vadd.f32 %v1127_v41, %v962_v52  ;;  %v982_v4 = vadd.f32 %v981_v56, %v840_v0 }
 0x201   :  { %v2581_v8 = vpop.f32.mrf.mxu0  ;;  %v2610_v42 = vpop.f32.mrf.mxu1 }
 0x205   :  { %v991_v62 = vpop.f32.mrf.mxu0  ;;  %v1133_v3 = vpop.f32.mrf.mxu1 }
 0x206   :  { %v1134_v7 = vadd.f32 %v1133_v3, %v972_v37  ;;  %v992_v18 = vadd.f32 %v991_v62, %v844_v48 }
 0x207   :  { %v2584_v60 = vpop.f32.mrf.mxu0  ;;  %v2613_v14 = vpop.f32.mrf.mxu1 }
 0x20a   :  { %v3675_v25 = vpop.f32.mrf.mxu0  ;;  %v1139_v54 = vpop.f32.mrf.mxu1 }
 0x20b   :  { %v3677_v15 = vadd.f32 %v1139_v54, %v982_v4 }
 0x20c   :  { %v2587_v50 = vpop.f32.mrf.mxu0  ;;  %v2616_v22 = vpop.f32.mrf.mxu1 }
 0x20d   :  { %v1002_v50 = vadd.f32 %v3675_v25, %v3673_v34 }
 0x20e   :  { %v3679_v24 = vpop.f32.mrf.mxu0 }
 0x20f   :  { %v1145_v26 = vpop.f32.mrf.mxu1 }
 0x210   :  { %v3681_v29 = vadd.f32 %v1145_v26, %v992_v18  ;;  %v2590_v57 = vpop.f32.mrf.mxu0 }
 0x211   :  { %v2619_v32 = vpop.f32.mrf.mxu1 }
 0x212   :  { %v3686_v63 = vpop.f32.mrf.mxu0  ;;  %v1012_v32 = vadd.f32 %v3679_v24, %v3671_v59 }
 0x213   :  { %v1151_v35 = vpop.f32.mrf.mxu1 }
 0x214   :  { %v2593_v36 = vpop.f32.mrf.mxu0  ;;  %v1152_v53 = vadd.f32 %v1151_v35, %v1002_v50 }
 0x215   :  { %v2622_v39 = vpop.f32.mrf.mxu1 }
 0x216   :  { %v1249_v28 = vpop.f32.mrf.mxu0 }
 0x217   :  { %v1157_v40 = vpop.f32.mrf.mxu1  ;;  %v3688_v5 = vadd.f32 %v1249_v28, %v1128_v61 }
 0x218   :  { %v2645_v9 = vpop.f32.mrf.mxu0 }
 0x219   :  { %v2625_v44 = vpop.f32.mrf.mxu1 }
 0x21a   :  { %v1256_v38 = vpop.f32.mrf.mxu0  ;;  %v1022_v44 = vadd.f32 %v3686_v63, %v3669_v33 }
 0x21b   :  { %v1163_v6 = vpop.f32.mrf.mxu1  ;;  %v3690_v45 = vadd.f32 %v1256_v38, %v1134_v7  ;;  %v1158_v38 = vadd.f32 %v1157_v40, %v1012_v32 }
 0x21c   :  { %v2648_v46 = vpop.f32.mrf.mxu0 }
 0x21d   :  { %v2628_v31 = vpop.f32.mrf.mxu1 }
 0x21e   :  { %v1263_v11 = vpop.f32.mrf.mxu0 }
 0x21f   :  { %v3692_v12 = vpop.f32.mrf.mxu1 }
 0x220   :  { %v2651_v13 = vpop.f32.mrf.mxu0 }
 0x221   :  { %v2680_v49 = vpop.f32.mrf.mxu1 }
 0x224   :  { %v1270_v1 = vpop.f32.mrf.mxu0 }
 0x225   :  { %v3694_v16 = vpop.f32.mrf.mxu1  ;;  %v1271_v31 = vadd.f32 %v1270_v1, %v3681_v29  ;;  %v1672_v29 = vld [vmem:[%s3887_s3] sm:$0x1]  ;;  %s2910_s3 = smov [#allocation2]  }
 0x226   :  { %v2654_v17 = vpop.f32.mrf.mxu0  ;;  %v1380_v1 = vadd.f32 %v3694_v16, %v3690_v45  ;;  %s2215_s12 = sshll.u32 %s2910_s3, 4  ;;  %s2216_s12 = int_to_ptr.vmem [resolvable:$true] %s2215_s12 }
 0x227   :  { %v2683_v19 = vpop.f32.mrf.mxu1  ;;  %v1264_v17 = vadd.f32 %v1263_v11, %v3677_v15  ;;  %s2883_s13 = scalar_lea.vmem %s2216_s12, 16  ;;  %s2887_s14 = scalar_lea.vmem %s2216_s12, 32 }
 0x228   :  { %v1277_v20 = vpop.f32.mrf.mxu0  ;;  %v1164_v19 = vadd.f32 %v1163_v6, %v1022_v44  ;;  %p2884_p0 = scmp.ne.s32.totalorder %s2216_s12, %s2883_s13  ;;  %p2888_p1 = scmp.lt.s32.totalorder %s2216_s12, %s2216_s12 }
 0x229   :  { %v1387_v21 = vpop.f32.mrf.mxu1  ;;  %v1278_v28 = vadd.f32 %v1277_v20, %v1152_v53  ;;  %p2889_p2 = scmp.lt.s32.totalorder %s2887_s14, %s2883_s13 }
 0x22a   :  { %v2657_v58 = vpop.f32.mrf.mxu0 }
 0x22b   :  { %v2686_v23 = vpop.f32.mrf.mxu1  ;;  %p2890_p3 = por %p2889_p2, %p2888_p1 }
 0x22c   :  { %v1284_v0 = vpop.f32.mrf.mxu0  ;;  %v1388_v23 = vadd.f32 %v1387_v21, %v1264_v17  ;;  %v1372_v21 = vadd.f32 %v3692_v12, %v3688_v5 }
 0x22d   :  { %v1395_v43 = vpop.f32.mrf.mxu1  ;;  %v1285_v13 = vadd.f32 %v1284_v0, %v1158_v38  ;;  %p2891_p4 = pnand %p2890_p3, %p2884_p0 }
 0x22e   :  { %v2660_v47 = vpop.f32.mrf.mxu0  ;;  %v1396_v59 = vadd.f32 %v1395_v43, %v1271_v31 }
 0x22f   :  { %v2689_v48 = vpop.f32.mrf.mxu1 }
 0x230   :  { %v1291_v51 = vpop.f32.mrf.mxu0 }
 0x231   :  { %v1403_v30 = vpop.f32.mrf.mxu1  ;;  %v1292_v63 = vadd.f32 %v1291_v51, %v1164_v19 }
 0x232   :  { %v2663_v10 = vpop.f32.mrf.mxu0  ;;  %v1404_v34 = vadd.f32 %v1403_v30, %v1278_v28  ;;  %v1679_v30 = vsel %vm858_vm3, %v1672_v29, 0 }
 0x233   :  { %v2692_v52 = vpop.f32.mrf.mxu1 }
 0x234   :  { %v1511_v55 = vpop.f32.mrf.mxu0 }
 0x235   :  { %v1411_v56 = vpop.f32.mrf.mxu1 }
 0x236   :  { %v2715_v41 = vpop.f32.mrf.mxu0  ;;  %v1412_v58 = vadd.f32 %v1411_v56, %v1285_v13 }
 0x237   :  { %v2695_v61 = vpop.f32.mrf.mxu1 }
 0x238   :  { %v1517_v8 = vpop.f32.mrf.mxu0 }
 0x239   :  { %v1419_v42 = vpop.f32.mrf.mxu1  ;;  %v1518_v10 = vadd.f32 %v1517_v8, %v1380_v1 }
 0x23a   :  { %v2718_v37 = vpop.f32.mrf.mxu0  ;;  %v1420_v43 = vadd.f32 %v1419_v42, %v1292_v63  ;;  %v3714_v42 = vand.u32 4294901760, %v1679_v30 }
 0x23b   :  { %v2698_v62 = vpop.f32.mrf.mxu1  ;;  %v1512_v37 = vadd.f32 %v1511_v55, %v1372_v21 }
 0x23c   :  { %v1523_v3 = vpop.f32.mrf.mxu0 }
 0x23d   :  { %v1625_v7 = vpop.f32.mrf.mxu1  ;;  %v1524_v15 = vadd.f32 %v1523_v3, %v1388_v23 }
 0x23e   :  { %v2721_v4 = vpop.f32.mrf.mxu0 }
 0x23f   :  { %v2750_v60 = vpop.f32.mrf.mxu1 }
 0x240   :  { %v1529_v14 = vpop.f32.mrf.mxu0  ;;  %v1626_v60 = vadd.f32 %v1625_v7, %v1512_v37 }
 0x241   :  { %v1631_v54 = vpop.f32.mrf.mxu1  ;;  %v1530_v47 = vadd.f32 %v1529_v14, %v1396_v59 }
 0x242   :  { %v2724_v18 = vpop.f32.mrf.mxu0  ;;  %v1632_v62 = vadd.f32 %v1631_v54, %v1518_v10  ;;  %v3725_v54 = vsub.f32 %v1679_v30, %v3714_v42 }
 0x243   :  { %v2753_v22 = vpop.f32.mrf.mxu1 }
 0x244   :  { %v1535_v26 = vpop.f32.mrf.mxu0  ;;  %v1666_v8 = vmax.f32 %v1632_v62, 0.0  ;;  %v1758_v28 = vand.u32 4294901760, %v3725_v54 }
 0x245   :  { %v1637_v57 = vpop.f32.mrf.mxu1  ;;  %v1536_v24 = vadd.f32 %v1535_v26, %v1404_v34  ;;  %v1665_v26 = vmax.f32 %v1626_v60, 0.0 }
 0x246   :  { %v2727_v27 = vpop.f32.mrf.mxu0  ;;  %v1638_v52 = vadd.f32 %v1637_v57, %v1524_v15 }
 0x247   :  { %v2756_v36 = vpop.f32.mrf.mxu1  ;;  %v3734_v27 = vand.u32 4294901760, %v1666_v8 }
 0x248   :  { %v1541_v39 = vpop.f32.mrf.mxu0  ;;  %v1667_v14 = vmax.f32 %v1638_v52, 0.0  ;;  %v1676_v52 = vpop.permute.xlu1 %1675 }
 0x249   :  { %v1643_v9 = vpop.f32.mrf.mxu1  ;;  %v1542_v40 = vadd.f32 %v1541_v39, %v1412_v58  ;;  %v3756_v31 = vsub.f32 %v1666_v8, %v3734_v27 }
 0x24a   :  { %v2730_v46 = vpop.f32.mrf.mxu0  ;;  %v1644_v11 = vadd.f32 %v1643_v9, %v1530_v47  ;;  %v3727_v57 = vand.u32 4294901760, %v1667_v14  ;;  %v3746_v9 = vand.u32 4294901760, %v1665_v26 }
 0x24b   :  { %v2759_v25 = vpop.f32.mrf.mxu1  ;;  %v1822_v19 = vand.u32 4294901760, %v3756_v31 }
 0x24c   :  { %v1547_v49 = vpop.f32.mrf.mxu0  ;;  %v1668_v4 = vmax.f32 %v1644_v11, 0.0  ;;  %v3749_v44 = vsub.f32 %v1667_v14, %v3727_v57  ;;  %v3771_v17 = vsub.f32 %v1665_v26, %v3746_v9 }
 0x24d   :  { %v1649_v35 = vpop.f32.mrf.mxu1  ;;  %v1548_v61 = vadd.f32 %v1547_v49, %v1420_v43  ;;  %v1759_v49 = vsub.f32 %v3725_v54, %v1758_v28  ;;  %v1823_v29 = vsub.f32 %v3756_v31, %v1822_v19 }
 0x24e   :  { %v2733_v20 = vpop.f32.mrf.mxu0  ;;  %v1650_v48 = vadd.f32 %v1649_v35, %v1536_v24  ;;  %v3718_v50 = vand.u32 4294901760, %v1668_v4  ;;  %v1815_v59 = vand.u32 4294901760, %v3749_v44  ;;  %v1829_v23 = vand.u32 4294901760, %v3771_v17 }
 0x24f   :  { %v2762_v33 = vpop.f32.mrf.mxu1  ;;  %v1824_v15 = vand.u32 4294901760, %v1823_v29 }
 0x250   :  { %v1669_v56 = vmax.f32 %v1650_v48, 0.0  ;;  %v3737_v53 = vsub.f32 %v1668_v4, %v3718_v50  ;;  %v1816_v47 = vsub.f32 %v3749_v44, %v1815_v59  ;;  %v1760_v33 = vand.u32 4294901760, %v1759_v49 }
 0x251   :  { %v1655_v0 = vpop.f32.mrf.mxu1 }
 0x252   :  { %v1656_v6 = vadd.f32 %v1655_v0, %v1542_v40  ;;  %v3716_v18 = vand.u32 4294901760, %v1669_v56  ;;  %v1808_v34 = vand.u32 4294901760, %v3737_v53  ;;  %v1830_v40 = vsub.f32 %v3771_v17, %v1829_v23 }
 0x253   :  { %v2765_v41 = vpop.f32.mrf.mxu1  ;;  %v1817_v1 = vand.u32 4294901760, %v1816_v47 }
 0x254   :  { %v1670_v51 = vmax.f32 %v1656_v6, 0.0  ;;  %v3730_v7 = vsub.f32 %v1669_v56, %v3716_v18  ;;  %v1809_v58 = vsub.f32 %v3737_v53, %v1808_v34  ;;  %v1831_v11 = vand.u32 4294901760, %v1830_v40 }
 0x255   :  { %v1661_v45 = vpop.f32.mrf.mxu1 }
 0x256   :  { %v3712_v16 = vand.u32 4294901760, %v1670_v51  ;;  %v1662_v3 = vadd.f32 %v1661_v45, %v1548_v61  ;;  %v1801_v38 = vand.u32 4294901760, %v3730_v7  ;;  %v1810_v63 = vand.u32 4294901760, %v1809_v58 }
 0x257   :  { %v2768_v5 = vpop.f32.mrf.mxu1 }
 0x258   :  { %v1671_v12 = vmax.f32 %v1662_v3, 0.0  ;;  %v3721_v22 = vsub.f32 %v1670_v51, %v3712_v16  ;;  %v1802_v24 = vsub.f32 %v3730_v7, %v1801_v38 }
 0x25a   :  { %v1682_v55 = vsel %vm95_vm0, %v1671_v12, 0  ;;  %v1794_v36 = vand.u32 4294901760, %v3721_v22  ;;  %v1803_v48 = vand.u32 4294901760, %v1802_v24 }
 0x25b   :  { %v3732_v32 = vand.u32 4294901760, %v1682_v55 }
 0x25c   :  { %v1795_v25 = vsub.f32 %v3721_v22, %v1794_v36 }
 0x25d   :  { %v3741_v39 = vsub.f32 %v1682_v55, %v3732_v32  ;;  %2770 = vmatpush3.msra.mxu0 %v3732_v32 }
 0x25e   :  { %2771 = vmatprep.subr.mxu0 %v2905_v2  ;;  %v1796_v20 = vand.u32 4294901760, %v1795_v25 }
 0x25f   :  { %v1787_v46 = vand.u32 4294901760, %v3741_v39  ;;  %2772 = vmatpush3.msra.mxu0 %v3712_v16 }
 0x260   :  { %2773 = vmatprep.subr.mxu0 %v2905_v2 }
 0x261   :  { %2774 = vmatpush3.msra.mxu0 %v3716_v18  ;;  %v1788_v13 = vsub.f32 %v3741_v39, %v1787_v46 }
 0x262   :  { %2775 = vmatprep.subr.mxu0 %v2905_v2 }
 0x263   :  { %2776 = vmatpush3.msra.mxu0 %v3718_v50  ;;  %v1789_v35 = vand.u32 4294901760, %v1788_v13 }
 0x264   :  { %2777 = vmatprep.subr.mxu0 %v2905_v2 }
 0x265   :  { %2778 = vmatpush3.msra.mxu0 %v3727_v57  ;;  %2787 = vmatpush3.msra.mxu1 %v1789_v35 }
 0x266   :  { %2779 = vmatprep.subr.mxu0 %v2905_v2  ;;  %2788 = vmatprep.subr.mxu1 %v2905_v2 }
 0x267   :  { %2780 = vmatpush3.msra.mxu0 %v3734_v27  ;;  %2789 = vmatpush3.msra.mxu1 %v1796_v20 }
 0x268   :  { %2781 = vmatprep.subr.mxu0 %v2905_v2  ;;  %2790 = vmatprep.subr.mxu1 %v2905_v2 }
 0x269   :  { %2782 = vmatpush3.msra.mxu0 %v3746_v9  ;;  %2791 = vmatpush3.msra.mxu1 %v1803_v48 }
 0x26a   :  { %2792 = vmatprep.subr.mxu1 %v2905_v2  ;;  %2803 = vmatprep.subr.mxu0 %v2905_v2 }
 0x26b   :  { %2784 = vmatmul.mubr.f32.vlgmr.msra.gmra.mxu0 %v1760_v33  ;;  %2793 = vmatpush3.msra.mxu1 %v1810_v63 }
 0x26c   :  { %2804 = vmatpush3.msra.mxu0 %v3741_v39  ;;  %2794 = vmatprep.subr.mxu1 %v2905_v2 }
 0x26d   :  { %2805 = vmatprep.subr.mxu0 %v2905_v2  ;;  %2795 = vmatpush3.msra.mxu1 %v1817_v1 }
 0x26e   :  { %2806 = vmatpush3.msra.mxu0 %v3721_v22  ;;  %2796 = vmatprep.subr.mxu1 %v2905_v2 }
 0x26f   :  { %2807 = vmatprep.subr.mxu0 %v2905_v2  ;;  %2797 = vmatpush3.msra.mxu1 %v1824_v15 }
 0x270   :  { %2808 = vmatpush3.msra.mxu0 %v3730_v7  ;;  %2798 = vmatprep.subr.mxu1 %v2905_v2 }
 0x271   :  { %2809 = vmatprep.subr.mxu0 %v2905_v2  ;;  %2799 = vmatpush3.msra.mxu1 %v1831_v11 }
 0x272   :  { %2810 = vmatpush3.msra.mxu0 %v3737_v53  ;;  %2820 = vmatprep.subr.mxu1 %v2905_v2 }
 0x273   :  { %2811 = vmatprep.subr.mxu0 %v2905_v2  ;;  %2801 = vmatmul.mubr.f32.vlgmr.msra.gmra.mxu1 %v3714_v42 }
 0x274   :  { %2812 = vmatpush3.msra.mxu0 %v3749_v44  ;;  %2821 = vmatpush3.msra.mxu1 %v3732_v32 }
 0x275   :  { %2813 = vmatprep.subr.mxu0 %v2905_v2  ;;  %2822 = vmatprep.subr.mxu1 %v2905_v2 }
 0x276   :  { %2814 = vmatpush3.msra.mxu0 %v3756_v31  ;;  %2823 = vmatpush3.msra.mxu1 %v3712_v16 }
 0x277   :  { %2815 = vmatprep.subr.mxu0 %v2905_v2  ;;  %2824 = vmatprep.subr.mxu1 %v2905_v2 }
 0x278   :  { %2816 = vmatpush3.msra.mxu0 %v3771_v17  ;;  %2825 = vmatpush3.msra.mxu1 %v3716_v18 }
 0x279   :  { %2817 = vmatprep.mubr.msk.f32.mxu0 %vm2906_vm1, %v2905_v2  ;;  %2826 = vmatprep.subr.mxu1 %v2905_v2 }
 0x27a   :  { %2837 = vmatprep.subr.mxu0 %v2905_v2  ;;  %2818 = vmatmul.mubr.f32.vlgmr.msra.gmra.mxu0 %v3725_v54 }
 0x27b   :  { %2827 = vmatpush3.msra.mxu1 %v3718_v50  ;;  %2838 = vmatpush3.msra.mxu0 %v1787_v46 }
 0x27c   :  { %2828 = vmatprep.subr.mxu1 %v2905_v2  ;;  %2839 = vmatprep.subr.mxu0 %v2905_v2 }
 0x27d   :  { %2829 = vmatpush3.msra.mxu1 %v3727_v57  ;;  %2840 = vmatpush3.msra.mxu0 %v1794_v36 }
 0x27e   :  { %2830 = vmatprep.subr.mxu1 %v2905_v2  ;;  %2841 = vmatprep.subr.mxu0 %v2905_v2 }
 0x27f   :  { %2831 = vmatpush3.msra.mxu1 %v3734_v27  ;;  %2842 = vmatpush3.msra.mxu0 %v1801_v38 }
 0x280   :  { %2832 = vmatprep.subr.mxu1 %v2905_v2  ;;  %2843 = vmatprep.subr.mxu0 %v2905_v2 }
 0x281   :  { %2833 = vmatpush3.msra.mxu1 %v3746_v9  ;;  %2844 = vmatpush3.msra.mxu0 %v1808_v34 }
 0x282   :  { %2834 = vmatprep.mubr.msk.f32.mxu1 %vm2906_vm1, %v2905_v2  ;;  %2845 = vmatprep.subr.mxu0 %v2905_v2 }
 0x283   :  { %2854 = vmatprep.subr.mxu1 %v2905_v2  ;;  %2835 = vmatmul.mubr.f32.vlgmr.msra.gmra.mxu1 %v1758_v28 }
 0x284   :  { %2846 = vmatpush3.msra.mxu0 %v1815_v59  ;;  %2855 = vmatpush3.msra.mxu1 %v3732_v32 }
 0x285   :  { %2847 = vmatprep.subr.mxu0 %v2905_v2  ;;  %2856 = vmatprep.subr.mxu1 %v2905_v2 }
 0x286   :  { %2848 = vmatpush3.msra.mxu0 %v1822_v19  ;;  %2857 = vmatpush3.msra.mxu1 %v3712_v16 }
 0x287   :  { %2849 = vmatprep.subr.mxu0 %v2905_v2  ;;  %2858 = vmatprep.subr.mxu1 %v2905_v2 }
 0x288   :  { %2850 = vmatpush3.msra.mxu0 %v1829_v23  ;;  %2859 = vmatpush3.msra.mxu1 %v3716_v18 }
 0x289   :  { %2860 = vmatprep.subr.mxu1 %v2905_v2  ;;  %2851 = vmatprep.mubr.msk.f32.mxu0 %vm2906_vm1, %v2905_v2 }
 0x28a   :  { %2861 = vmatpush3.msra.mxu1 %v3718_v50  ;;  %2852 = vmatmul.mubr.f32.vlgmr.msra.gmra.mxu0 %v3714_v42 }
 0x28b   :  { %2862 = vmatprep.subr.mxu1 %v2905_v2  ;;  %2868 = vmatprep.mubr.msk.f32.mxu1 %vm2906_vm1, %v2905_v2 }
 0x28c   :  { %2863 = vmatpush3.msra.mxu1 %v3727_v57 }
 0x28d   :  { %2864 = vmatprep.subr.mxu1 %v2905_v2 }
 0x28e   :  { %2865 = vmatpush3.msra.mxu1 %v3734_v27 }
 0x28f   :  { %2866 = vmatprep.subr.mxu1 %v2905_v2 }
 0x290   :  { %2867 = vmatpush3.msra.mxu1 %v3746_v9 }
 0x291   :  { %2869 = vmatmul.mubr.f32.vlgmr.msra.gmra.mxu1 %v3714_v42 }
 0x32b   :  { %v1762_v0 = vpop.f32.mrf.mxu0 }
 0x32c   :  { %v1763_v61 = vadd.f32 %v1762_v0, %v1676_v52 }
 0x32d   :  { %v2785_v43 = vpop.f32.mrf.mxu0 }
 0x333   :  { %v1868_v6 = vpop.f32.mrf.mxu1 }
 0x334   :  { %v1869_v51 = vadd.f32 %v1868_v6, %v1763_v61 }
 0x335   :  { %v2802_v30 = vpop.f32.mrf.mxu1 }
 0x33a   :  { %v1954_v21 = vpop.f32.mrf.mxu0 }
 0x33b   :  { %v1955_v62 = vadd.f32 %v1954_v21, %v1869_v51 }
 0x33c   :  { %v2819_v10 = vpop.f32.mrf.mxu0 }
 0x343   :  { %v2034_v56 = vpop.f32.mrf.mxu1 }
 0x344   :  { %v2035_v45 = vadd.f32 %v2034_v56, %v1955_v62 }
 0x345   :  { %v2836_v41 = vpop.f32.mrf.mxu1 }
 0x34a   :  { %v2126_v37 = vpop.f32.mrf.mxu0 }
 0x34b   :  { %v2127_v2 = vadd.f32 %v2126_v37, %v2035_v45 }
 0x34c   :  { %v2853_v4 = vpop.f32.mrf.mxu0 }
 0x351   :  { %v2204_v16 = vpop.f32.mrf.mxu1 }
 0x352   :  { %v2205_v3 = vadd.f32 %v2204_v16, %v2127_v2 }
 0x353   :  { %v2870_v42 = vpop.f32.mrf.mxu1 }
 0x354   :  { %2208 = vst [vmem:[#allocation2] sm:$0x1] %v2205_v3 }
 0x355   :  { %2894 = shalt.err (!%p2891_p4)
}
 0x356   :  { %2218 = dma.vmem_to_hbm [thread:$0]  %s2216_s12, 16, %s3889_s5, [#allocation3]  }
 0x357   :  { %2903 = dma.done.wait [#allocation3], 16  }
 0x358   :  { %2904 = vsyncadd [#allocation3], 4294967280 }
 0x359   :  { %2222 = vsyncpa [#allocation3], 1 }

</bundles_post_ra>
